<compile_context>
chip_gen: v5e
topology: v5e:2x2
jax: 0.10.0
libtpu: 0.0.40
codegen_flags: <defaults>
</compile_context>

<pallas_src>
import jax
import jax.numpy as jnp
from jax import lax
from jax.experimental import pallas as pl
from jax.experimental.pallas import tpu as pltpu

NUM_LAYERS = 18          # StyleGAN2-FFHQ w+ layers
NUM_COMPONENTS = 80      # ipca_c80
LATENT_DIM = 512


def _pca_edit_kernel(ids_ref, vals_ref, comp_ref, out_ref):
    """Single grid step.

    ids_ref  : SMEM int32[N]      (scalar prefetch)
    vals_ref : SMEM float32[N]    (scalar prefetch)
    comp_ref : VMEM (C, 512)      whole PCA component table, resident in VMEM
    out_ref  : VMEM (18, 512)     lane/sublane-dense output block
    """
    n_edits = ids_ref.shape[0]  # static

    def body(i, acc):
        row = comp_ref[pl.ds(ids_ref[i], 1), :]      # (1, 512) dynamic row slice
        return acc + row * vals_ref[i]

    acc = lax.fori_loop(
        0, n_edits, body,
        jnp.zeros((1, LATENT_DIM), jnp.float32),
        unroll=True,                                  # short fixed trip count
    )

    # Broadcast the accumulated edit vector to all 18 style layers once.
    out_ref[...] = jnp.broadcast_to(acc, out_ref.shape)


def pca_stylegan_edits(lat_comp, edit_ids, edit_values):
    """lat_comp: (C, 1, 512) f32; edit_ids: (N,) i32; edit_values: (N,) f32.

    Returns (18, 1, 512) f32, matching the PyTorch module exactly.
    """
    C, one, D = lat_comp.shape
    assert one == 1 and D == LATENT_DIM
    n_edits = int(edit_ids.shape[0])

    # Empty edit list: PyTorch returns zeros; the kernel would never run its
    # loop either, but avoid a zero-length SMEM prefetch array entirely.
    if n_edits == 0:
        return jnp.zeros((NUM_LAYERS, 1, D), jnp.float32)

    comp2d = lat_comp.reshape(C, D).astype(jnp.float32)
    # Clip ids so an out-of-range edit id cannot silently read foreign VMEM.
    ids = jnp.clip(edit_ids.astype(jnp.int32), 0, C - 1)
    vals = edit_values.astype(jnp.float32)

    grid_spec = pltpu.PrefetchScalarGridSpec(
        num_scalar_prefetch=2,
        grid=(1,),
        in_specs=[
            # Entire component table as one dense VMEM block (160 KiB).
            pl.BlockSpec((C, D), lambda i, ids_r, vals_r: (0, 0)),
        ],
        out_specs=pl.BlockSpec((NUM_LAYERS, D), lambda i, ids_r, vals_r: (0, 0)),
    )

    out2d = pl.pallas_call(
        _pca_edit_kernel,
        out_shape=jax.ShapeDtypeStruct((NUM_LAYERS, D), jnp.float32),
        grid_spec=grid_spec,
        compiler_params=pltpu.CompilerParams(
            dimension_semantics=("arbitrary",),
        ),
    )(ids, vals, comp2d)

    return out2d.reshape(NUM_LAYERS, 1, D)


def pca_stylegan_edits_ref(lat_comp, edit_ids, edit_values):
    """Pure-JAX reference mirroring the PyTorch loop."""
    out = jnp.zeros((NUM_LAYERS, 1, LATENT_DIM), jnp.float32)
    for i in range(edit_ids.shape[0]):
        out = out + lat_comp[edit_ids[i]] * edit_values[i]
    return out


if __name__ == "__main__":
    key = jax.random.PRNGKey(0)

    # Deterministic synthetic "pretrained" PCA components (stand-in for the
    # stylegan2-ffhq ipca_c80 npz): shape (80, 1, 512) float32.
    lat_comp = jax.random.normal(
        key, (NUM_COMPONENTS, 1, LATENT_DIM), dtype=jnp.float32
    )

    # Example `edits` list (as the PyTorch forward would receive), flattened
    # into id / value arrays.  A repeated id accumulates, like the loop.
    edits = [
        {"id": 3, "value": 1.5},
        {"id": 7, "value": -0.75},
        {"id": 42, "value": 0.3},
        {"id": 3, "value": 0.25},
    ]
    edit_ids = jnp.asarray([int(e["id"]) for e in edits], dtype=jnp.int32)
    edit_values = jnp.asarray([float(e["value"]) for e in edits], dtype=jnp.float32)

    out = pca_stylegan_edits(lat_comp, edit_ids, edit_values)
    out = jax.block_until_ready(out)

    ref = pca_stylegan_edits_ref(lat_comp, edit_ids, edit_values)
    assert out.shape == (NUM_LAYERS, 1, LATENT_DIM)
    assert out.dtype == jnp.float32
    assert jnp.allclose(out, ref, atol=1e-5, rtol=1e-5)

    # Empty-edit-list path (wrapper short-circuit) must return zeros.
    out_empty = pca_stylegan_edits(
        lat_comp, jnp.zeros((0,), jnp.int32), jnp.zeros((0,), jnp.float32)
    )
    assert jnp.allclose(out_empty, jnp.zeros((NUM_LAYERS, 1, LATENT_DIM)))

    print("KERNEL_OK")
</pallas_src>

<mosaic_0001>
module attributes {stable_mosaic.version = 11 : i64} {
  func.func @_pca_edit_kernel(%arg0: i32, %arg1: memref<4xi32, #tpu.memory_space<smem>>, %arg2: memref<4xf32, #tpu.memory_space<smem>>, %arg3: memref<80x512xf32, #tpu.memory_space<vmem>>, %arg4: memref<18x512xf32, #tpu.memory_space<vmem>>) attributes {dimension_semantics = [#tpu.dimension_semantics<arbitrary>], iteration_bounds = array<i64: 1>, scalar_prefetch = 2 : i64, scratch_operands = 0 : i64, tpu.core_type = #tpu.core_type<tc>, window_params = [{pipeline_mode = #tpu.pipeline_mode<synchronous>, transform_indices = @transform_0, window_bounds = array<i64: 80, 512>}, {pipeline_mode = #tpu.pipeline_mode<synchronous>, transform_indices = @transform_1, window_bounds = array<i64: 18, 512>}]} {
    %cst = arith.constant 0.000000e+00 : f32
    %0 = vector.broadcast %cst : f32 to vector<1x512xf32>
    %c0_i32 = arith.constant 0 : i32
    %1 = arith.index_cast %c0_i32 : i32 to index
    %2 = memref.load %arg1[%1] : memref<4xi32, #tpu.memory_space<smem>>
    %3 = arith.index_cast %2 : i32 to index
    %c0 = arith.constant 0 : index
    %4 = vector.load %arg3[%3, %c0] : memref<80x512xf32, #tpu.memory_space<vmem>>, vector<1x512xf32>
    %5 = arith.index_cast %c0_i32 : i32 to index
    %6 = memref.load %arg2[%5] : memref<4xf32, #tpu.memory_space<smem>>
    %7 = vector.broadcast %6 : f32 to vector<1x512xf32>
    %8 = arith.mulf %4, %7 : vector<1x512xf32>
    %9 = arith.addf %0, %8 : vector<1x512xf32>
    %c1_i32 = arith.constant 1 : i32
    %10 = arith.index_cast %c1_i32 : i32 to index
    %11 = memref.load %arg1[%10] : memref<4xi32, #tpu.memory_space<smem>>
    %12 = arith.index_cast %11 : i32 to index
    %c0_0 = arith.constant 0 : index
    %13 = vector.load %arg3[%12, %c0_0] : memref<80x512xf32, #tpu.memory_space<vmem>>, vector<1x512xf32>
    %14 = arith.index_cast %c1_i32 : i32 to index
    %15 = memref.load %arg2[%14] : memref<4xf32, #tpu.memory_space<smem>>
    %16 = vector.broadcast %15 : f32 to vector<1x512xf32>
    %17 = arith.mulf %13, %16 : vector<1x512xf32>
    %18 = arith.addf %9, %17 : vector<1x512xf32>
    %c2_i32 = arith.constant 2 : i32
    %19 = arith.index_cast %c2_i32 : i32 to index
    %20 = memref.load %arg1[%19] : memref<4xi32, #tpu.memory_space<smem>>
    %21 = arith.index_cast %20 : i32 to index
    %c0_1 = arith.constant 0 : index
    %22 = vector.load %arg3[%21, %c0_1] : memref<80x512xf32, #tpu.memory_space<vmem>>, vector<1x512xf32>
    %23 = arith.index_cast %c2_i32 : i32 to index
    %24 = memref.load %arg2[%23] : memref<4xf32, #tpu.memory_space<smem>>
    %25 = vector.broadcast %24 : f32 to vector<1x512xf32>
    %26 = arith.mulf %22, %25 : vector<1x512xf32>
    %27 = arith.addf %18, %26 : vector<1x512xf32>
    %c3_i32 = arith.constant 3 : i32
    %28 = arith.index_cast %c3_i32 : i32 to index
    %29 = memref.load %arg1[%28] : memref<4xi32, #tpu.memory_space<smem>>
    %30 = arith.index_cast %29 : i32 to index
    %c0_2 = arith.constant 0 : index
    %31 = vector.load %arg3[%30, %c0_2] : memref<80x512xf32, #tpu.memory_space<vmem>>, vector<1x512xf32>
    %32 = arith.index_cast %c3_i32 : i32 to index
    %33 = memref.load %arg2[%32] : memref<4xf32, #tpu.memory_space<smem>>
    %34 = vector.broadcast %33 : f32 to vector<1x512xf32>
    %35 = arith.mulf %31, %34 : vector<1x512xf32>
    %36 = arith.addf %27, %35 : vector<1x512xf32>
    %c4_i32 = arith.constant 4 : i32
    %37 = vector.shape_cast %36 : vector<1x512xf32> to vector<1x512xf32>
    %38 = vector.broadcast %37 : vector<1x512xf32> to vector<18x512xf32>
    %c0_3 = arith.constant 0 : index
    %c0_4 = arith.constant 0 : index
    %39 = vector.load %arg4[%c0_3, %c0_4] : memref<18x512xf32, #tpu.memory_space<vmem>>, vector<18x512xf32>
    tpu.vector_store %arg4[%c0_3, %c0_4], %38 {strides = array<i32>} : memref<18x512xf32, #tpu.memory_space<vmem>>, vector<18x512xf32>,
    return
  }
  func.func @transform_0(%arg0: i32, %arg1: memref<4xi32, #tpu.memory_space<smem>>, %arg2: memref<4xf32, #tpu.memory_space<smem>>) -> (i32, i32) {
    %c0_i32 = arith.constant 0 : i32
    %c0_i32_0 = arith.constant 0 : i32
    %c0_i32_1 = arith.constant 0 : i32
    return %c0_i32, %c0_i32_0 : i32, i32
  }
  func.func @transform_1(%arg0: i32, %arg1: memref<4xi32, #tpu.memory_space<smem>>, %arg2: memref<4xf32, #tpu.memory_space<smem>>) -> (i32, i32) {
    %c0_i32 = arith.constant 0 : i32
    %c0_i32_0 = arith.constant 0 : i32
    %c0_i32_1 = arith.constant 0 : i32
    return %c0_i32, %c0_i32_0 : i32, i32
  }
}

</mosaic_0001>

<bundles_post_ra>
// kernel: tpu_custom_call.1
= control target key start
LH: loop header
LB: loop body
LE: loop exit
PB: predicated region body
PF: predicated region fallthrough
CT: control target
= control target key end

     0   :  { %s250_s18 = smov [#allocation3]   ;;  %s251_s19 = smov [#allocation4]   ;;  %s294_s0 = inlined_call_operand.hbm [shape: s32[4], index: 0, kind: input, shape index: {}]   ;;  %s295_s2 = inlined_call_operand.hbm [shape: f32[80,512], index: 2, kind: input, shape index: {}]   ;;  %s296_s3 = inlined_call_operand.hbm [shape: f32[18,512], index: 3, kind: output, shape index: {}]   ;;  %s297_s1 = inlined_call_operand.hbm [shape: f32[4], index: 1, kind: input, shape index: {}]  }
   0x1   :  { %s9_s14 = sshll.u32 %s294_s0, 4  ;;  %s14_s17 = sshll.u32 %s297_s1, 4  ;;  %s10_s14 = int_to_ptr.hbm [resolvable:$true] %s9_s14  ;;  %s15_s17 = int_to_ptr.hbm [resolvable:$true] %s14_s17 }
   0x2   :  { %12 = dma.hbm_to_smem %s10_s14, 16, %s250_s18, [#allocation2] }
   0x3   :  { %17 = dma.hbm_to_smem %s15_s17, 16, %s251_s19, [#allocation2] }
   0x4   :  { %244 = dma.done.wait [#allocation2], 32 }
   0x5   :  { %245 = vsyncadd [#allocation2], 4294967264 }
   0x6   :  { %20 = sfence }
   0x7   :  { %21 = vsyncpa [#allocation6], 0 }
   0x8   :  { %22 = vsyncpa [#allocation7], 0  ;;  %s27_s22 = sshll.u32 %s295_s2, 4  ;;  %s252_s0 = smov [#allocation5]   ;;  %s28_s22 = int_to_ptr.hbm [resolvable:$true] %s27_s22 }
   0x9   :  { %s29_s23 = sshll.u32 %s252_s0, 4  ;;  %s253_s1 = smov 512   ;;  %s30_s23 = int_to_ptr.vmem [resolvable:$true] %s29_s23 }
   0xa   :  { %s254_s24 = smov 32  }
   0xb   :  { %35 = dma.hbm_to_vmem [thread:$0]  %s28_s22, 5120, %s30_s23, [#allocation6], %s253_s1, %s253_s1, %s254_s24  }
   0xc   :  { %246 = dma.done.wait [#allocation6], 5120  }
   0xd   :  { %247 = vsyncadd [#allocation6], 4294962176  ;;  %s40_s25 = sld [smem:[#allocation3]] }
   0xe   :  { %s50_s26 = sld [smem:[#allocation4]] }
   0xf   :  { %s150_s27 = sld [smem:[#allocation3 + $0x1]] }
  0x10   :  { %s153_s28 = sld [smem:[#allocation4 + $0x1]] }
  0x11   :  { %s154_s29 = sld [smem:[#allocation3 + $0x2]] }
  0x12   :  { %s157_s30 = sld [smem:[#allocation4 + $0x2]] }
  0x13   :  { %s41_s4 = sshra.s32 %s40_s25, 3  ;;  %s44_s2 = sand.u32 7, %s40_s25 }
  0x14   :  { %s162_s5 = sshll.u32 %s41_s4, 5  ;;  %s158_s6 = sld [smem:[#allocation3 + $0x3]]  ;;  %v51_v0 = vstv %s50_s26 }
  0x15   :  { %s47_s7 = sadd.s32 %s162_s5, %s44_s2  ;;  %s55_s8 = sshra.s32 %s150_s27, 3 }
  0x16   :  { %s58_s9 = sand.u32 7, %s150_s27  ;;  %s48_s10 = scalar_lea.vmem [#allocation5], %s47_s7  ;;  %v65_v2 = vstv %s153_s28 }
  0x17   :  { %v49_v1 = vld [vmem:[%s48_s10] ss:$8 sm:$0xf]  ;;  %s163_s11 = sshll.u32 %s55_s8, 5  ;;  %s69_s12 = sshra.s32 %s154_s29, 3 }
  0x18   :  { %s61_s13 = sadd.s32 %s163_s11, %s58_s9  ;;  %s72_s14 = sand.u32 7, %s154_s29  ;;  %v52_v3 = vmul.f32 %v51_v0, %v49_v1  ;;  %v79_v5 = vstv %s157_s30 }
  0x19   :  { %s164_s15 = sshll.u32 %s69_s12, 5  ;;  %s62_s16 = scalar_lea.vmem [#allocation5], %s61_s13 }
  0x1a   :  { %v63_v4 = vld [vmem:[%s62_s16] ss:$8 sm:$0xf]  ;;  %s75_s17 = sadd.s32 %s164_s15, %s72_s14  ;;  %s83_s18 = sshra.s32 %s158_s6, 3 }
  0x1b   :  { %v66_v6 = vmul.f32 %v65_v2, %v63_v4  ;;  %s86_s19 = sand.u32 7, %s158_s6  ;;  %s76_s20 = scalar_lea.vmem [#allocation5], %s75_s17 }
  0x1c   :  { %v77_v7 = vld [vmem:[%s76_s20] ss:$8 sm:$0xf]  ;;  %s165_s21 = sshll.u32 %s83_s18, 5  ;;  %s161_s22 = sld [smem:[#allocation4 + $0x3]] }
  0x1d   :  { %v67_v8 = vadd.f32 %v66_v6, %v52_v3  ;;  %v80_v9 = vmul.f32 %v79_v5, %v77_v7  ;;  %s89_s0 = sadd.s32 %s165_s21, %s86_s19  ;;  %s255_s25 = smov [#allocation8]  }
  0x1e   :  { %s90_s23 = scalar_lea.vmem [#allocation5], %s89_s0  ;;  %s121_s26 = sshll.u32 %s255_s25, 4  ;;  %s122_s26 = int_to_ptr.vmem [resolvable:$true] %s121_s26 }
  0x1f   :  { %v91_v10 = vld [vmem:[%s90_s23] ss:$8 sm:$0xf]  ;;  %v81_v11 = vadd.f32 %v80_v9, %v67_v8  ;;  %s123_s29 = sshll.u32 %s296_s3, 4  ;;  %s124_s29 = int_to_ptr.hbm [resolvable:$true] %s123_s29 }
  0x22   :  { %v93_v12 = vstv %s161_s22 }
  0x23   :  { %v94_v13 = vmul.f32 %v93_v12, %v91_v10 }
  0x25   :  { %v95_v14 = vadd.f32 %v94_v13, %v81_v11 }
  0x27   :  { %v97_v15 = vperm.slane %v95_v14, 0  ;;  %v98_v16 = vperm.slane %v95_v14, 1  ;;  %v99_v17 = vperm.slane %v95_v14, 2  ;;  %v100_v18 = vperm.slane %v95_v14, 3 }
  0x29   :  { %105 = vst [vmem:[#allocation8] sm:$0xff] %v97_v15 }
  0x2a   :  { %109 = vst [vmem:[#allocation8 + $0x20] sm:$0xff] %v97_v15 }
  0x2b   :  { %113 = vst [vmem:[#allocation8 + $0x40] sm:$0x3] %v97_v15 }
  0x2c   :  { %106 = vst [vmem:[#allocation8 + $0x8] sm:$0xff] %v98_v16 }
  0x2d   :  { %110 = vst [vmem:[#allocation8 + $0x28] sm:$0xff] %v98_v16 }
  0x2e   :  { %114 = vst [vmem:[#allocation8 + $0x48] sm:$0x3] %v98_v16 }
  0x2f   :  { %107 = vst [vmem:[#allocation8 + $0x10] sm:$0xff] %v99_v17 }
  0x30   :  { %111 = vst [vmem:[#allocation8 + $0x30] sm:$0xff] %v99_v17 }
  0x31   :  { %115 = vst [vmem:[#allocation8 + $0x50] sm:$0x3] %v99_v17 }
  0x32   :  { %108 = vst [vmem:[#allocation8 + $0x18] sm:$0xff] %v100_v18 }
  0x33   :  { %112 = vst [vmem:[#allocation8 + $0x38] sm:$0xff] %v100_v18 }
  0x34   :  { %116 = vst [vmem:[#allocation8 + $0x58] sm:$0x3] %v100_v18 }
  0x35   :  { %129 = dma.vmem_to_hbm [thread:$0]  %s122_s26, 1536, %s124_s29, [#allocation7], %s253_s1, %s253_s1, %s254_s24  }
  0x36   :  { %248 = dma.done.wait [#allocation7], 1536  }
  0x37   :  { %249 = vsyncadd [#allocation7], 4294965760 }
  0x38   :  { %134 = vsyncpa [#allocation6], 1 }
  0x39   :  { %135 = vsyncpa [#allocation7], 1 }

</bundles_post_ra>
